<compile_context>
chip_gen: v6e
topology: v6e:2x2x1
jax: 0.10.0
libtpu: 0.0.40
codegen_flags: <defaults>
</compile_context>

<pallas_src>
import functools

import numpy as np
import jax
import jax.numpy as jnp
from jax.experimental import pallas as pl
from jax.experimental.pallas import tpu as pltpu

# Flip to jnp.bfloat16 on v6e/v7x for 2x MXU rate (weights/activations cast at
# the dot only; accumulation stays f32 via preferred_element_type).
_MM_DTYPE = jnp.float32

_BLOCKS = ('enc1', 'enc2', 'enc3', 'enc4', 'middle',
           'dec1', 'dec2', 'dec3', 'dec4')


# ---------------------------------------------------------------------------
# One-time weight folding (PyTorch layouts -> channel-major, per-tap matrices)
# ---------------------------------------------------------------------------

def _fold_conv3(w, b, scale, shift):
    """Conv1d(k=3,pad=1) + eval BN -> 3 per-tap (Cout,Cin) mats + (Cout,1) bias."""
    w = np.asarray(w, np.float32)              # (Cout, Cin, 3)
    b = np.asarray(b, np.float32)
    scale = np.asarray(scale, np.float32)
    shift = np.asarray(shift, np.float32)
    taps = [w[:, :, k] * scale[:, None] for k in range(3)]
    bias = (b * scale + shift).reshape(-1, 1)
    return taps, bias


def _fold_sep_conv3(sw, sb, dw, db, scale, shift):
    """depthwise(k=3) o pointwise(k=1) + eval BN, algebraically folded.

    Valid because the reference Block has no nonlinearity between the two."""
    sw = np.asarray(sw, np.float32)            # (Cin, 1, 3)
    sb = np.asarray(sb, np.float32)            # (Cin,)
    dw = np.asarray(dw, np.float32)            # (Cout, Cin, 1)
    db = np.asarray(db, np.float32)            # (Cout,)
    scale = np.asarray(scale, np.float32)
    shift = np.asarray(shift, np.float32)
    pw = dw[:, :, 0]                           # (Cout, Cin)
    taps = [(pw * sw[:, 0, k][None, :]) * scale[:, None] for k in range(3)]
    bias = ((pw @ sb + db) * scale + shift).reshape(-1, 1)
    return taps, bias


def _fold_unet_entries(raw, prefix):
    """Fold one U-Net's params into named 2-D matrices (channel-major)."""
    ent = {}

    def put(name, arr):
        ent[f'{prefix}.{name}'] = np.asarray(arr, np.float32)

    for bname in _BLOCKS:
        r = raw[bname]
        if 's1_w' in r:
            taps1, b1 = _fold_sep_conv3(r['s1_w'], r['s1_b'], r['d1_w'], r['d1_b'],
                                        r['bn1_scale'], r['bn1_shift'])
            taps2, b2 = _fold_sep_conv3(r['s2_w'], r['s2_b'], r['d2_w'], r['d2_b'],
                                        r['bn2_scale'], r['bn2_shift'])
        else:
            taps1, b1 = _fold_conv3(r['c1_w'], r['c1_b'],
                                    r['bn1_scale'], r['bn1_shift'])
            taps2, b2 = _fold_conv3(r['c2_w'], r['c2_b'],
                                    r['bn2_scale'], r['bn2_shift'])
        if bname.startswith('dec'):
            # decoder conv1 input is torch.cat([skip, upsampled], dim=1):
            # split its weight so no channel concat is needed in-kernel.
            half = taps1[0].shape[1] // 2
            for k in range(3):
                put(f'{bname}.c1a.k{k}', taps1[k][:, :half])
                put(f'{bname}.c1b.k{k}', taps1[k][:, half:])
        else:
            for k in range(3):
                put(f'{bname}.c1.k{k}', taps1[k])
        put(f'{bname}.c1.b', b1)
        for k in range(3):
            put(f'{bname}.c2.k{k}', taps2[k])
        put(f'{bname}.c2.b', b2)

    for i in (1, 2, 3, 4):
        w = np.asarray(raw[f'up{i}_w'], np.float32)      # torch: (Cin, Cout, 5)
        b = np.asarray(raw[f'up{i}_b'], np.float32)
        cin, cout, _ = w.shape
        cpad = ((cout + 7) // 8) * 8
        taps = [np.ascontiguousarray(w[:, :, k].T) for k in range(5)]  # (Cout, Cin)
        # Polyphase: output phase r (r = n mod 4) uses tap k = r + 1 on x[m];
        # phase 3 additionally uses tap k = 0 on x[m + 1].
        wmain = np.zeros((4 * cpad, cin), np.float32)
        for r_ in range(4):
            wmain[r_ * cpad:r_ * cpad + cout, :] = taps[r_ + 1]
        put(f'up{i}.Wmain', wmain)
        put(f'up{i}.W0', taps[0])
        put(f'up{i}.b', b.reshape(-1, 1))

    put('final.W', np.asarray(raw['final_w'], np.float32)[:, :, 0])
    put('final.b', np.asarray(raw['final_b'], np.float32).reshape(-1, 1))
    return ent


def _pack_slab(entries):
    """Pack all parameter matrices into one (rows, Kpad) f32 slab.

    meta[name] = (row_offset, rows, cols); every entry starts on an 8-row
    (sublane) boundary and at lane 0, so in-kernel windows are aligned."""
    kmax = max(v.shape[1] for v in entries.values())
    kmax = ((kmax + 127) // 128) * 128
    meta, chunks, off = {}, [], 0
    for name, v in entries.items():
        r, c = v.shape
        rpad = ((r + 7) // 8) * 8
        buf = np.zeros((rpad, kmax), np.float32)
        buf[:r, :c] = v
        chunks.append(buf)
        meta[name] = (off, r, c)
        off += rpad
    return jnp.asarray(np.concatenate(chunks, axis=0)), meta


def _probe_roll_sign():
    """Probe pltpu.roll's rotation direction once on-device.

    Returns +1 if pltpu.roll matches np.roll (elements move toward higher
    indices), else -1; the kernel normalises with this so the conv-halo math
    is correct regardless of the backend convention."""
    def kern(x_ref, o_ref):
        o_ref[...] = pltpu.roll(x_ref[...], 1, axis=1)

    x = jax.lax.broadcasted_iota(jnp.float32, (8, 128), 1)
    y = pl.pallas_call(
        kern, out_shape=jax.ShapeDtypeStruct((8, 128), jnp.float32))(x)
    return 1 if float(np.asarray(y)[0, 0]) > 64.0 else -1


def prepare_params(raw_params):
    """One-time fold / re-layout / packing of all WNet parameters."""
    entries = {}
    entries.update(_fold_unet_entries(raw_params['uenc'], 'uenc'))
    entries.update(_fold_unet_entries(raw_params['udec'], 'udec'))
    slab, meta = _pack_slab(entries)
    cfg = {'squeeze': int(meta['uenc.final.b'][1]),
           'out_chans': int(meta['udec.final.b'][1]),
           'roll_sign': _probe_roll_sign()}
    return {'slab': slab, 'meta': meta, 'cfg': cfg}


# ---------------------------------------------------------------------------
# The fused whole-WNet Pallas kernel (one batch element per grid step)
# ---------------------------------------------------------------------------

def _wnet_kernel(x_ref, slab_ref, enc_ref, dec_ref, *, meta, L, roll_sign):
    f32 = jnp.float32
    lane = jax.lax.broadcasted_iota(jnp.int32, (1, L), 1)

    def p(name):
        off, rows, cols = meta[name]
        return slab_ref[off:off + rows, 0:cols]

    def mm(a, b):
        return jnp.dot(a.astype(_MM_DTYPE), b.astype(_MM_DTYPE),
                       preferred_element_type=f32)

    def rot(x, k):
        """np.roll(x, k, axis=1) independent of the backend rotate direction."""
        k = (roll_sign * k) % L
        if k == 0:
            return x
        return pltpu.roll(x, k, axis=1)

    def shift_fwd(x, s):
        """y[:, l] = x[:, l - s], zero for l < s  (left halo / phase placement)."""
        if s <= 0:
            return x
        if s >= L:
            return jnp.zeros_like(x)
        return jnp.where(lane < s, 0.0, rot(x, s))

    def shift_bwd(x, s):
        """y[:, l] = x[:, l + s], zero for l >= L - s  (right halo)."""
        if s <= 0:
            return x
        if s >= L:
            return jnp.zeros_like(x)
        return jnp.where(lane >= L - s, 0.0, rot(x, -s))

    def conv3(parts, s, bname):
        """Conv1d(k=3, pad=1) at lane stride s + folded eval-BN + clamp(0)/ReLU.

        `parts` = list of (activation, weight-name-base); two parts for the
        decoder skip path, so no channel concat is needed in-kernel."""
        acc = None
        halo = s < L          # at the deepest level the halos are pure zero-pad
        for xv, base in parts:
            if xv.shape[0] == 1:      # Cin == 1: degenerate outer product -> VPU
                t = p(f'{base}.k1') * xv
                if halo:
                    t = t + p(f'{base}.k0') * shift_fwd(xv, s)
                    t = t + p(f'{base}.k2') * shift_bwd(xv, s)
            else:
                t = mm(p(f'{base}.k1'), xv)
                if halo:
                    t = t + mm(p(f'{base}.k0'), shift_fwd(xv, s))
                    t = t + mm(p(f'{base}.k2'), shift_bwd(xv, s))
            acc = t if acc is None else acc + t
        return jnp.maximum(acc + p(bname), 0.0)

    def block(x, s, name):
        h = conv3([(x, f'{name}.c1')], s, f'{name}.c1.b')
        return conv3([(h, f'{name}.c2')], s, f'{name}.c2.b')

    def block_cat(skip, up, s, name):
        h = conv3([(skip, f'{name}.c1a'), (up, f'{name}.c1b')], s, f'{name}.c1.b')
        return conv3([(h, f'{name}.c2')], s, f'{name}.c2.b')

    def maxpool4(x, s):
        """max_pool1d(4): windowed max on the VPU; valid lanes go stride s -> 4s
        (no lane compaction -- coarser levels stay at full lane width)."""
        w = jnp.maximum(x, shift_bwd(x, s))
        return jnp.maximum(w, shift_bwd(w, 2 * s))

    def conv_transpose4(x, s_in, name):
        """ConvTranspose1d(k=5, stride=4, pad=1, out_pad=1), polyphase form.

        One dot produces all 4 phases (stacked on rows), one extra dot handles
        the k=0 tap (needs x[m+1]); phases are placed on their output lanes
        with shifts + lane masks -- no zero-stuffing, no interleave matmul."""
        s_out = s_in // 4
        cout = meta[f'{name}.b'][1]
        cpad = meta[f'{name}.Wmain'][1] // 4
        ph_all = mm(p(f'{name}.Wmain'), x)                       # (4*cpad, L)
        corr = mm(p(f'{name}.W0'), shift_bwd(x, s_in)) if s_in < L else None
        out = None
        for r in range(4):
            ph = ph_all[r * cpad:r * cpad + cout, :]
            if r == 3 and corr is not None:
                ph = ph + corr
            sel = (lane & (s_in - 1)) == r * s_out
            contrib = jnp.where(sel, shift_fwd(ph, r * s_out), 0.0)
            out = contrib if out is None else out + contrib
        return out + p(f'{name}.b')

    def softmax_channels(x):
        m = jnp.max(x, axis=0, keepdims=True)
        e = jnp.exp(x - m)
        ssum = jnp.sum(e, axis=0, keepdims=True)
        return e * pl.reciprocal(ssum, approx=True)              # divide -> EUP

    def unet(x, pre):
        e1 = block(x, 1, f'{pre}.enc1')
        e2 = block(maxpool4(e1, 1), 4, f'{pre}.enc2')
        e3 = block(maxpool4(e2, 4), 16, f'{pre}.enc3')
        e4 = block(maxpool4(e3, 16), 64, f'{pre}.enc4')
        mid = block(maxpool4(e4, 64), 256, f'{pre}.middle')
        d1 = block_cat(e4, conv_transpose4(mid, 256, f'{pre}.up1'), 64, f'{pre}.dec1')
        d2 = block_cat(e3, conv_transpose4(d1, 64, f'{pre}.up2'), 16, f'{pre}.dec2')
        d3 = block_cat(e2, conv_transpose4(d2, 16, f'{pre}.up3'), 4, f'{pre}.dec3')
        d4 = block_cat(e1, conv_transpose4(d3, 4, f'{pre}.up4'), 1, f'{pre}.dec4')
        return mm(p(f'{pre}.final.W'), d4) + p(f'{pre}.final.b')

    x = x_ref[...].astype(f32)
    enc = unet(x, 'uenc')
    enc_ref[...] = enc.astype(enc_ref.dtype)
    # WNet applies F.softmax(enc, dim=1) between the two U-Nets (fused here).
    dec = unet(softmax_channels(enc), 'udec')
    dec_ref[...] = dec.astype(dec_ref.dtype)


# ---------------------------------------------------------------------------
# WNet forward (one pallas_call total)
# ---------------------------------------------------------------------------

def wnet_forward(x_ncl, params, returns='both'):
    """x_ncl: (B, C_in, L) exactly like the PyTorch module (NCL layout)."""
    if returns not in ('enc', 'dec', 'both'):
        raise ValueError('Invalid returns, returns must be in [enc dec both]')
    slab, meta, cfg = params['slab'], params['meta'], params['cfg']
    B, c_in, L = x_ncl.shape
    assert L % 256 == 0, 'sequence length must be divisible by 4**4'
    squeeze, out_ch = cfg['squeeze'], cfg['out_chans']

    kernel = functools.partial(_wnet_kernel, meta=meta, L=L,
                               roll_sign=cfg['roll_sign'])
    enc, dec = pl.pallas_call(
        kernel,
        out_shape=(jax.ShapeDtypeStruct((B, squeeze, L), jnp.float32),
                   jax.ShapeDtypeStruct((B, out_ch, L), jnp.float32)),
        grid=(B,),
        in_specs=[
            pl.BlockSpec((None, c_in, L), lambda b: (b, 0, 0)),
            # Grid-invariant packed parameter slab: one DMA, resident in VMEM.
            pl.BlockSpec(slab.shape, lambda b: (0, 0)),
        ],
        out_specs=(
            pl.BlockSpec((None, squeeze, L), lambda b: (b, 0, 0)),
            pl.BlockSpec((None, out_ch, L), lambda b: (b, 0, 0)),
        ),
        compiler_params=pltpu.CompilerParams(
            # Batch axis shards across TensorCores on v7x (needs B >= 2; for
            # B == 1 split the top-level L into a second parallel axis).
            dimension_semantics=("parallel",)),
    )(x_ncl, slab)

    if returns == 'enc':
        return enc
    if returns == 'dec':
        return dec
    return enc, dec


# ---------------------------------------------------------------------------
# Deterministic parameter initialization (PyTorch layouts, as in the spec)
# ---------------------------------------------------------------------------

def _uniform(key, shape, bound):
    return jax.random.uniform(key, shape, jnp.float32, -bound, bound)


def init_conv(key, cout, cin, k):
    kw, kb = jax.random.split(key)
    bound = 1.0 / float(np.sqrt(cin * k))
    return _uniform(kw, (cout, cin, k), bound), _uniform(kb, (cout,), bound)


def init_convT(key, cin, cout, k):
    kw, kb = jax.random.split(key)
    bound = 1.0 / float(np.sqrt(cout * k))
    return _uniform(kw, (cin, cout, k), bound), _uniform(kb, (cout,), bound)


def init_block(key, cin, cout, seperable):
    ks = jax.random.split(key, 4)
    prm = {}
    if seperable:
        prm['s1_w'], prm['s1_b'] = init_conv(ks[0], cin, 1, 3)      # depthwise
        prm['d1_w'], prm['d1_b'] = init_conv(ks[1], cout, cin, 1)   # pointwise
        prm['s2_w'], prm['s2_b'] = init_conv(ks[2], cout, 1, 3)
        prm['d2_w'], prm['d2_b'] = init_conv(ks[3], cout, cout, 1)
    else:
        prm['c1_w'], prm['c1_b'] = init_conv(ks[0], cout, cin, 3)
        prm['c2_w'], prm['c2_b'] = init_conv(ks[1], cout, cout, 3)
    # Eval-mode BatchNorm1d with default stats/affine: y = x / sqrt(1 + eps).
    # For trained checkpoints fold the real running_mean/var/gamma/beta here.
    eps = 1e-5
    scale = jnp.full((cout,), 1.0 / np.sqrt(1.0 + eps), jnp.float32)
    shift = jnp.zeros((cout,), jnp.float32)
    prm['bn1_scale'], prm['bn1_shift'] = scale, shift
    prm['bn2_scale'], prm['bn2_shift'] = scale, shift
    return prm


def init_unet(key, in_ch, out_ch, ch_mul):
    ks = jax.random.split(key, 14)
    P = {}
    P['enc1'] = init_block(ks[0], in_ch, ch_mul, False)
    P['enc2'] = init_block(ks[1], ch_mul, 2 * ch_mul, True)
    P['enc3'] = init_block(ks[2], 2 * ch_mul, 4 * ch_mul, True)
    P['enc4'] = init_block(ks[3], 4 * ch_mul, 8 * ch_mul, True)
    P['middle'] = init_block(ks[4], 8 * ch_mul, 16 * ch_mul, True)
    P['up1_w'], P['up1_b'] = init_convT(ks[5], 16 * ch_mul, 8 * ch_mul, 5)
    P['dec1'] = init_block(ks[6], 16 * ch_mul, 8 * ch_mul, True)
    P['up2_w'], P['up2_b'] = init_convT(ks[7], 8 * ch_mul, 4 * ch_mul, 5)
    P['dec2'] = init_block(ks[8], 8 * ch_mul, 4 * ch_mul, True)
    P['up3_w'], P['up3_b'] = init_convT(ks[9], 4 * ch_mul, 2 * ch_mul, 5)
    P['dec3'] = init_block(ks[10], 4 * ch_mul, 2 * ch_mul, True)
    P['up4_w'], P['up4_b'] = init_convT(ks[11], 2 * ch_mul, ch_mul, 5)
    P['dec4'] = init_block(ks[12], 2 * ch_mul, ch_mul, False)
    P['final_w'], P['final_b'] = init_conv(ks[13], out_ch, ch_mul, 1)
    return P


def init_wnet(key, squeeze, ch_mul, in_chans, out_chans=1000):
    if out_chans == 1000:
        out_chans = in_chans
    k1, k2 = jax.random.split(key)
    return {'uenc': init_unet(k1, in_chans, squeeze, ch_mul),
            'udec': init_unet(k2, squeeze, out_chans, ch_mul)}


# ---------------------------------------------------------------------------

if __name__ == "__main__":
    key = jax.random.PRNGKey(0)
    kx, kp = jax.random.split(key)

    B, in_chans, L = 2, 1, 256          # L must be divisible by 4**4 = 256
    squeeze, ch_mul = 4, 4

    x = jax.random.normal(kx, (B, in_chans, L), jnp.float32)    # NCL like torch
    raw = init_wnet(kp, squeeze, ch_mul, in_chans)
    params = prepare_params(raw)        # one-time fold / re-layout / packing

    fwd = jax.jit(lambda xin: wnet_forward(xin, params))
    enc, dec = fwd(x)
    jax.block_until_ready((enc, dec))

    assert enc.shape == (B, squeeze, L), enc.shape
    assert dec.shape == (B, in_chans, L), dec.shape
    assert bool(jnp.all(jnp.isfinite(enc))) and bool(jnp.all(jnp.isfinite(dec)))
    print("KERNEL_OK")
</pallas_src>

<mosaic_0001>
module attributes {stable_mosaic.version = 11 : i64} {
  func.func @kern(%arg0: memref<8x128xf32, #tpu.memory_space<vmem>>, %arg1: memref<8x128xf32, #tpu.memory_space<vmem>>) attributes {dimension_semantics = [], scalar_prefetch = 0 : i64, scratch_operands = 0 : i64, tpu.core_type = #tpu.core_type<tc>} {
    %c0 = arith.constant 0 : index
    %c0_0 = arith.constant 0 : index
    %0 = vector.load %arg0[%c0, %c0_0] : memref<8x128xf32, #tpu.memory_space<vmem>>, vector<8x128xf32>
    %c1_i32 = arith.constant 1 : i32
    %1 = tpu.dynamic_rotate %0 by %c1_i32 dim 1 : vector<8x128xf32>, i32 -> vector<8x128xf32>
    %c0_1 = arith.constant 0 : index
    %c0_2 = arith.constant 0 : index
    %2 = vector.load %arg1[%c0_1, %c0_2] : memref<8x128xf32, #tpu.memory_space<vmem>>, vector<8x128xf32>
    tpu.vector_store %arg1[%c0_1, %c0_2], %1 {strides = array<i32>} : memref<8x128xf32, #tpu.memory_space<vmem>>, vector<8x128xf32>,
    return
  }
}

</mosaic_0001>

<bundles_post_ra>
// kernel: tpu_custom_call.1
= control target key start
LH: loop header
LB: loop body
LE: loop exit
PB: predicated region body
PF: predicated region fallthrough
CT: control target
= control target key end

     0   :  { %6 = vsyncpa [#allocation3], 0  ;;  %s106_s0 = inlined_call_operand.hbm [shape: f32[8,128], index: 0, kind: input, shape index: {}]   ;;  %s107_s1 = inlined_call_operand.hbm [shape: f32[8,128], index: 1, kind: output, shape index: {}]  }
   0x1   :  { %7 = vsyncpa [#allocation4], 0  ;;  %s87_s6 = smov [#allocation2]  }
   0x2   :  { %s14_s7 = sshll.u32 %s87_s6, 4  ;;  %s15_s7 = int_to_ptr.vmem [resolvable:$true] %s14_s7 }
   0x3   :  { %s51_s8 = scalar_lea.vmem %s15_s7, 128  ;;  %p56_p1 = scmp.lt.s32.totalorder %s15_s7, %s15_s7 }
   0x4   :  { %p52_p0 = scmp.ne.s32.totalorder %s15_s7, %s51_s8  ;;  %p57_p2 = scmp.lt.s32.totalorder %s51_s8, %s51_s8 }
   0x6   :  { %p58_p3 = por %p57_p2, %p56_p1 }
   0x8   :  { %p59_p4 = pnand %p58_p3, %p52_p0 }
   0xa   :  { %62 = shalt.err (!%p59_p4)
}
   0xb   :  { %17 = dma.hbm_to_vmem [thread:$0]  %s106_s0, 128, %s15_s7, [#allocation3]  }
   0xc   :  { %83 = dma.done.wait [#allocation3], 128  }
   0xd   :  { %84 = vsyncadd [#allocation3], 4294967168  ;;  %v21_v0 = vld [vmem:[#allocation2] sm:$0xff]  ;;  %s88_s11 = smov 1   ;;  %s89_s12 = smov [#allocation5]  }
   0xe   :  { %22 = vrot.lane.b32.xlu0 %v21_v0, %s88_s11  ;;  %s31_s13 = sshll.u32 %s89_s12, 4  ;;  %s32_s13 = int_to_ptr.vmem [resolvable:$true] %s31_s13 }
   0xf   :  { %s63_s14 = scalar_lea.vmem %s32_s13, 128  ;;  %p68_p6 = scmp.lt.s32.totalorder %s32_s13, %s32_s13 }
  0x10   :  { %p64_p5 = scmp.ne.s32.totalorder %s32_s13, %s63_s14  ;;  %p69_p7 = scmp.lt.s32.totalorder %s63_s14, %s63_s14 }
  0x12   :  { %p70_p8 = por %p69_p7, %p68_p6 }
  0x14   :  { %p71_p9 = pnand %p70_p8, %p64_p5 }
  0x80   :  { %v23_v1 = vpop.permute.xlu0 %22 }
  0x81   :  { %24 = vst [vmem:[#allocation5] sm:$0xff] %v23_v1 }
  0x82   :  { %74 = shalt.err (!%p71_p9)
}
  0x83   :  { %34 = dma.vmem_to_hbm [thread:$0]  %s32_s13, 128, %s107_s1, [#allocation4]  }
  0x84   :  { %85 = dma.done.wait [#allocation4], 128  }
  0x85   :  { %86 = vsyncadd [#allocation4], 4294967168 }
  0x86   :  { %38 = vsyncpa [#allocation3], 1 }
  0x87   :  { %39 = vsyncpa [#allocation4], 1 }

</bundles_post_ra>
